<compile_context>
chip_gen: v6e
topology: v6e:2x2x1
jax: 0.10.0
libtpu: 0.0.40
codegen_flags: <defaults>
</compile_context>

<pallas_src>
import jax
import jax.numpy as jnp
from jax.experimental import pallas as pl
from jax.experimental.pallas import tpu as pltpu


def _round_up(n, m):
    return ((n + m - 1) // m) * m


def _choose_batch_tile(B, max_tile):
    """Pick (tb, b_pad) with b_pad % tb == 0, avoiding any batch padding when
    possible (padding would cost an extra full HBM copy of x in the wrapper)."""
    # Clamp to a multiple of 8 and a VMEM-safe upper bound.
    max_tile = max(8, min(4096, (max_tile // 8) * 8))
    if B <= max_tile:
        # Single full-extent tile: no 8-row divisibility constraint, no pad.
        return B, B
    b8 = _round_up(B, 8)
    # Prefer a multiple-of-8 tile in [max_tile/2, max_tile] that divides b8
    # exactly (zero batch padding, >= 2 grid steps for v7x megacore).
    for tb in range(min(max_tile, b8), max(max_tile // 2, 8) - 1, -8):
        if b8 % tb == 0:
            return tb, b8
    tb = min(max_tile, b8)
    return tb, _round_up(b8, tb)


def _make_kernel(s_pad, w_pad, offs):
    off_w1, off_b1, off_w2, off_b2, off_w3, off_b3 = offs
    W = w_pad

    def kernel(x_ref, p_ref, o_ref):
        x = x_ref[...]                                      # (tb, s_pad) f32

        # fc1 + relu  (columns hidden_dim..W-1 of w1/b1 are zero -> h1 cols 0)
        w1 = p_ref[off_w1:off_w1 + s_pad, :]                # (s_pad, W)
        b1 = p_ref[off_b1:off_b1 + 1, :]                    # (1, W)
        h1 = jnp.dot(x, w1, preferred_element_type=jnp.float32) + b1
        h1 = jnp.maximum(h1, 0.0)

        # fc2 + relu  (zero-padded rows/cols contribute exactly zero)
        w2 = p_ref[off_w2:off_w2 + W, :]                    # (W, W)
        b2 = p_ref[off_b2:off_b2 + 1, :]
        h2 = jnp.dot(h1, w2, preferred_element_type=jnp.float32) + b2
        h2 = jnp.maximum(h2, 0.0)

        # fc3 -- q has the real Q-values in columns [0, action_dim); the rest
        # are zero.  Full-width store keeps the output lane-dense (unmasked
        # vst + dense writeback DMA); the wrapper slices the 4 real columns.
        w3 = p_ref[off_w3:off_w3 + W, :]                    # (W, W)
        b3 = p_ref[off_b3:off_b3 + 1, :]
        q = jnp.dot(h2, w3, preferred_element_type=jnp.float32) + b3
        o_ref[...] = q.astype(o_ref.dtype)                  # (tb, W) lane-dense

    return kernel


def pack_params(params, state_dim, action_dim, hidden_dim):
    """Pack w1,b1,w2,b2,w3,b3 into one (rows, 128) f32 buffer.

    Row offsets are 8-aligned so every in-kernel slice is sublane-aligned.
    All matrices are zero-padded out to 128 columns (and w2/w3 to 128 rows)
    so every matmul and, crucially, the output store are full-lane-width.
    """
    assert hidden_dim <= 128 and action_dim <= 128
    s_pad = _round_up(state_dim, 8)
    W = _round_up(max(hidden_dim, action_dim), 128)   # lane-dense width (128)

    off_w1 = 0
    off_b1 = off_w1 + s_pad
    off_w2 = off_b1 + 8
    off_b2 = off_w2 + W
    off_w3 = off_b2 + 8
    off_b3 = off_w3 + W
    n_rows = _round_up(off_b3 + 1, 8)                 # 288 rows for H=64

    packed = jnp.zeros((n_rows, W), jnp.float32)
    packed = packed.at[off_w1:off_w1 + state_dim, :hidden_dim].set(params["w1"])
    packed = packed.at[off_b1, :hidden_dim].set(params["b1"].reshape(-1))
    packed = packed.at[off_w2:off_w2 + hidden_dim, :hidden_dim].set(params["w2"])
    packed = packed.at[off_b2, :hidden_dim].set(params["b2"].reshape(-1))
    packed = packed.at[off_w3:off_w3 + hidden_dim, :action_dim].set(params["w3"])
    packed = packed.at[off_b3, :action_dim].set(params["b3"].reshape(-1))

    offs = (off_w1, off_b1, off_w2, off_b2, off_w3, off_b3)
    return packed, offs, s_pad


def qnetwork_forward(x, packed, offs, *, state_dim, action_dim, s_pad,
                     batch_tile=2048):
    """x: (B, state_dim) f32 -> (B, action_dim) f32 Q-values."""
    B = x.shape[0]
    n_rows, W = packed.shape
    tb, b_pad = _choose_batch_tile(B, batch_tile)

    # For LunarLander (state_dim=8, any B <= batch_tile or a multiple of 8)
    # this branch is never taken -> no extra HBM copy of x.
    if B != b_pad or state_dim != s_pad:
        xp = jnp.zeros((b_pad, s_pad), x.dtype).at[:B, :state_dim].set(x)
    else:
        xp = x

    kernel = _make_kernel(s_pad, W, offs)

    cp_kwargs = dict(dimension_semantics=("parallel",))
    if tb > 2048:
        # Lane-padded x/out tiles (double-buffered) + f32 intermediates are
        # ~3.5 KiB per row per step; raise the scoped-VMEM limit for big tiles.
        cp_kwargs["vmem_limit_bytes"] = 32 * 1024 * 1024

    out = pl.pallas_call(
        kernel,
        out_shape=jax.ShapeDtypeStruct((b_pad, W), jnp.float32),
        grid=(b_pad // tb,),
        in_specs=[
            # x: tiled over the batch grid axis (double-buffered by Pallas).
            pl.BlockSpec((tb, s_pad), lambda i: (i, 0)),
            # packed params: constant block index -> DMA'd once, stays
            # VMEM-resident for the whole grid.
            pl.BlockSpec((n_rows, W), lambda i: (0, 0)),
        ],
        # Full 128-lane output block: unmasked stores + dense writeback DMA.
        out_specs=pl.BlockSpec((tb, W), lambda i: (i, 0)),
        compiler_params=pltpu.CompilerParams(**cp_kwargs),
    )(xp, packed)

    # Slice the real Q-values out of the lane-padded output in the wrapper.
    return out[:B, :action_dim]


def init_params(key, state_dim, action_dim, hidden_dim=64):
    """Deterministic init matching nn.Linear shapes (stored as (in, out))."""
    ks = jax.random.split(key, 6)

    def linear(kw, kb, fan_in, fan_out):
        # torch.nn.Linear default: U(-1/sqrt(fan_in), 1/sqrt(fan_in))
        bound = 1.0 / jnp.sqrt(jnp.asarray(fan_in, jnp.float32))
        w = jax.random.uniform(kw, (fan_in, fan_out), jnp.float32, -bound, bound)
        b = jax.random.uniform(kb, (1, fan_out), jnp.float32, -bound, bound)
        return w, b

    w1, b1 = linear(ks[0], ks[1], state_dim, hidden_dim)
    w2, b2 = linear(ks[2], ks[3], hidden_dim, hidden_dim)
    w3, b3 = linear(ks[4], ks[5], hidden_dim, action_dim)
    return dict(w1=w1, b1=b1, w2=w2, b2=b2, w3=w3, b3=b3)


def qnetwork_ref(x, p):
    """Pure-JAX reference for correctness check."""
    h1 = jnp.maximum(x @ p["w1"] + p["b1"], 0.0)
    h2 = jnp.maximum(h1 @ p["w2"] + p["b2"], 0.0)
    return h2 @ p["w3"] + p["b3"]


if __name__ == "__main__":
    # LunarLander-v2: state_dim = 8, action_dim = 4
    state_dim, action_dim, hidden_dim = 8, 4, 64

    key = jax.random.PRNGKey(0)
    k_params, k_x1, k_x2, k_x3 = jax.random.split(key, 4)
    params = init_params(k_params, state_dim, action_dim, hidden_dim)
    packed, offs, s_pad = pack_params(params, state_dim, action_dim, hidden_dim)

    def fwd(xin, **kw):
        return qnetwork_forward(
            xin, packed, offs, state_dim=state_dim, action_dim=action_dim,
            s_pad=s_pad, **kw)

    # Small-batch check (batch=2, single-env inference): one full-extent tile,
    # no input padding, no pad copy.
    x_small = jax.random.normal(k_x1, (2, state_dim), jnp.float32)
    q_small = jax.block_until_ready(fwd(x_small))
    assert q_small.shape == (2, action_dim)
    assert jnp.allclose(q_small, qnetwork_ref(x_small, params),
                        atol=1e-5, rtol=1e-5), "mismatch vs reference (B=2)"

    # Typical replay-buffer batch: a single 1000-row step (multiple of 8 ->
    # no wrapper pad copy), optimal for single-TC v5e/v6e.
    x_mid = jax.random.normal(k_x2, (1000, state_dim), jnp.float32)
    q_mid = jax.block_until_ready(fwd(x_mid))
    assert q_mid.shape == (1000, action_dim)
    assert jnp.allclose(q_mid, qnetwork_ref(x_mid, params),
                        atol=1e-5, rtol=1e-5), "mismatch vs reference (B=1000)"

    # Large batch: 2 "parallel" grid steps of 2048 rows (shards across both
    # TensorCores on v7x), still no wrapper pad copy.
    x_big = jax.random.normal(k_x3, (4096, state_dim), jnp.float32)
    q_big = jax.block_until_ready(fwd(x_big))
    assert q_big.shape == (4096, action_dim)
    assert jnp.allclose(q_big, qnetwork_ref(x_big, params),
                        atol=1e-5, rtol=1e-5), "mismatch vs reference (B=4096)"

    print("KERNEL_OK")
</pallas_src>

<mosaic_0001>
module attributes {stable_mosaic.version = 11 : i64} {
  func.func @kernel(%arg0: i32, %arg1: memref<2x8xf32, #tpu.memory_space<vmem>>, %arg2: memref<288x128xf32, #tpu.memory_space<vmem>>, %arg3: memref<2x128xf32, #tpu.memory_space<vmem>>) attributes {dimension_semantics = [#tpu.dimension_semantics<parallel>], iteration_bounds = array<i64: 1>, scalar_prefetch = 0 : i64, scratch_operands = 0 : i64, tpu.core_type = #tpu.core_type<tc>, window_params = [{transform_indices = @transform_0, window_bounds = array<i64: 2, 8>}, {pipeline_mode = #tpu.pipeline_mode<synchronous>, transform_indices = @transform_1, window_bounds = array<i64: 288, 128>}, {transform_indices = @transform_2, window_bounds = array<i64: 2, 128>}]} {
    %c0 = arith.constant 0 : index
    %c0_0 = arith.constant 0 : index
    %0 = vector.load %arg1[%c0, %c0_0] : memref<2x8xf32, #tpu.memory_space<vmem>>, vector<2x8xf32>
    %c0_1 = arith.constant 0 : index
    %c0_2 = arith.constant 0 : index
    %1 = vector.load %arg2[%c0_1, %c0_2] : memref<288x128xf32, #tpu.memory_space<vmem>>, vector<8x128xf32>
    %c8 = arith.constant 8 : index
    %c0_3 = arith.constant 0 : index
    %2 = vector.load %arg2[%c8, %c0_3] : memref<288x128xf32, #tpu.memory_space<vmem>>, vector<1x128xf32>
    %cst = arith.constant dense<0.000000e+00> : vector<2x128xf32>
    %3 = tpu.matmul %0, %1, %cst {dimension_numbers = #tpu.dot_dimension_numbers<[1], [0], [0], [1], [0, 0, 1, 1], [], []>} : vector<2x8xf32>, vector<8x128xf32>, vector<2x128xf32> -> vector<2x128xf32>
    %4 = vector.broadcast %2 : vector<1x128xf32> to vector<2x128xf32>
    %5 = arith.addf %3, %4 : vector<2x128xf32>
    %cst_4 = arith.constant 0.000000e+00 : f32
    %6 = vector.broadcast %cst_4 : f32 to vector<2x128xf32>
    %7 = arith.maximumf %5, %6 : vector<2x128xf32>
    %c16 = arith.constant 16 : index
    %c0_5 = arith.constant 0 : index
    %8 = vector.load %arg2[%c16, %c0_5] : memref<288x128xf32, #tpu.memory_space<vmem>>, vector<128x128xf32>
    %c144 = arith.constant 144 : index
    %c0_6 = arith.constant 0 : index
    %9 = vector.load %arg2[%c144, %c0_6] : memref<288x128xf32, #tpu.memory_space<vmem>>, vector<1x128xf32>
    %cst_7 = arith.constant dense<0.000000e+00> : vector<2x128xf32>
    %10 = tpu.matmul %7, %8, %cst_7 {dimension_numbers = #tpu.dot_dimension_numbers<[1], [0], [0], [1], [0, 0, 1, 1], [], []>} : vector<2x128xf32>, vector<128x128xf32>, vector<2x128xf32> -> vector<2x128xf32>
    %11 = vector.broadcast %9 : vector<1x128xf32> to vector<2x128xf32>
    %12 = arith.addf %10, %11 : vector<2x128xf32>
    %cst_8 = arith.constant 0.000000e+00 : f32
    %13 = vector.broadcast %cst_8 : f32 to vector<2x128xf32>
    %14 = arith.maximumf %12, %13 : vector<2x128xf32>
    %c152 = arith.constant 152 : index
    %c0_9 = arith.constant 0 : index
    %15 = vector.load %arg2[%c152, %c0_9] : memref<288x128xf32, #tpu.memory_space<vmem>>, vector<128x128xf32>
    %c280 = arith.constant 280 : index
    %c0_10 = arith.constant 0 : index
    %16 = vector.load %arg2[%c280, %c0_10] : memref<288x128xf32, #tpu.memory_space<vmem>>, vector<1x128xf32>
    %cst_11 = arith.constant dense<0.000000e+00> : vector<2x128xf32>
    %17 = tpu.matmul %14, %15, %cst_11 {dimension_numbers = #tpu.dot_dimension_numbers<[1], [0], [0], [1], [0, 0, 1, 1], [], []>} : vector<2x128xf32>, vector<128x128xf32>, vector<2x128xf32> -> vector<2x128xf32>
    %18 = vector.broadcast %16 : vector<1x128xf32> to vector<2x128xf32>
    %19 = arith.addf %17, %18 : vector<2x128xf32>
    %c0_12 = arith.constant 0 : index
    %c0_13 = arith.constant 0 : index
    %20 = vector.load %arg3[%c0_12, %c0_13] : memref<2x128xf32, #tpu.memory_space<vmem>>, vector<2x128xf32>
    tpu.vector_store %arg3[%c0_12, %c0_13], %19 {strides = array<i32>} : memref<2x128xf32, #tpu.memory_space<vmem>>, vector<2x128xf32>,
    return
  }
  func.func @transform_0(%arg0: i32) -> (i32, i32) {
    %c0_i32 = arith.constant 0 : i32
    %c0_i32_0 = arith.constant 0 : i32
    return %arg0, %c0_i32 : i32, i32
  }
  func.func @transform_1(%arg0: i32) -> (i32, i32) {
    %c0_i32 = arith.constant 0 : i32
    %c0_i32_0 = arith.constant 0 : i32
    %c0_i32_1 = arith.constant 0 : i32
    return %c0_i32, %c0_i32_0 : i32, i32
  }
  func.func @transform_2(%arg0: i32) -> (i32, i32) {
    %c0_i32 = arith.constant 0 : i32
    %c0_i32_0 = arith.constant 0 : i32
    return %arg0, %c0_i32 : i32, i32
  }
}

</mosaic_0001>

<bundles_post_ra>
// kernel: tpu_custom_call.1
= control target key start
LH: loop header
LB: loop body
LE: loop exit
PB: predicated region body
PF: predicated region fallthrough
CT: control target
= control target key end

     0   :  { %7 = vsyncpa [#allocation3], 0  ;;  %s578_s0 = inlined_call_operand.hbm [shape: f32[2,8], index: 0, kind: input, shape index: {}]   ;;  %s579_s1 = inlined_call_operand.hbm [shape: f32[288,128], index: 1, kind: input, shape index: {}]   ;;  %s580_s2 = inlined_call_operand.hbm [shape: f32[2,128], index: 2, kind: output, shape index: {}]  }
   0x1   :  { %8 = vsyncpa [#allocation6], 0 }
   0x2   :  { %9 = vsyncpa [#allocation4], 0  ;;  %s508_s9 = smov [#allocation2]   ;;  %s509_s11 = smov [#allocation5]  }
   0x3   :  { %s16_s10 = sshll.u32 %s508_s9, 4  ;;  %s25_s12 = sshll.u32 %s509_s11, 4  ;;  %s17_s10 = int_to_ptr.vmem [resolvable:$true] %s16_s10  ;;  %s26_s12 = int_to_ptr.vmem [resolvable:$true] %s25_s12 }
   0x4   :  { %s450_s13 = scalar_lea.vmem %s17_s10, 32  ;;  %p455_p1 = scmp.lt.s32.totalorder %s17_s10, %s17_s10 }
   0x5   :  { %p451_p0 = scmp.ne.s32.totalorder %s17_s10, %s450_s13  ;;  %p456_p2 = scmp.lt.s32.totalorder %s450_s13, %s450_s13 }
   0x7   :  { %p457_p3 = por %p456_p2, %p455_p1 }
   0x9   :  { %p458_p4 = pnand %p457_p3, %p451_p0 }
   0xb   :  { %461 = shalt.err (!%p458_p4)
}
   0xc   :  { %19 = dma.hbm_to_vmem [thread:$0]  %s578_s0, 32, %s17_s10, [#allocation3]  }
   0xd   :  { %s470_s16 = scalar_lea.vmem %s26_s12, 4608  ;;  %p475_p6 = scmp.lt.s32.totalorder %s26_s12, %s26_s12 }
   0xe   :  { %p471_p5 = scmp.ne.s32.totalorder %s26_s12, %s470_s16  ;;  %p476_p7 = scmp.lt.s32.totalorder %s470_s16, %s470_s16 }
  0x10   :  { %p477_p8 = por %p476_p7, %p475_p6 }
  0x12   :  { %p478_p9 = pnand %p477_p8, %p471_p5 }
  0x14   :  { %481 = shalt.err (!%p478_p9)
}
  0x15   :  { %s510_s17 = smov 128   ;;  %s511_s18 = smov 8  }
  0x16   :  { %31 = dma.hbm_to_vmem [thread:$0]  %s579_s1, 4608, %s26_s12, [#allocation6], %s510_s17, %s510_s17, %s511_s18  }
  0x17   :  { %502 = dma.done.wait [#allocation3], 32  }
  0x18   :  { %503 = vsyncadd [#allocation3], 4294967264 }
  0x19   :  { %504 = dma.done.wait [#allocation6], 4608  }
  0x1a   :  { %505 = vsyncadd [#allocation6], 4294962688  ;;  %v512_v0 = vmov 0.0   ;;  %vm513_vm0 = vmmov 0   ;;  %vm45_vm1 = vcmask 64512   ;;  %v39_v1 = vld [vmem:[#allocation5] sm:$0xff] }
  0x1b   :  { %360 = vmatprep.subr.mxu0 %v512_v0  ;;  %362 = vmatprep.mubr.msk.f32.mxu0 %vm513_vm0, %v512_v0  ;;  %v38_v2 = vld [vmem:[#allocation2] sm:$0x3]  ;;  %v135_v3 = vld [vmem:[#allocation5 + $0x88] sm:$0xff]  ;;  %v134_v4 = vld [vmem:[#allocation5 + $0x80] sm:$0xff]  ;;  %s514_s0 = smov [#allocation7]  }
  0x1c   :  { %365 = vmatprep.subr.mxu1 %v512_v0  ;;  %397 = vmatprep.mubr.msk.f32.mxu1 %vm513_vm0, %v512_v0  ;;  %v133_v5 = vld [vmem:[#allocation5 + $0x78] sm:$0xff]  ;;  %v132_v6 = vld [vmem:[#allocation5 + $0x70] sm:$0xff]  ;;  %v131_v7 = vld [vmem:[#allocation5 + $0x68] sm:$0xff]  ;;  %s310_s1 = sshll.u32 %s514_s0, 4  ;;  %s311_s1 = int_to_ptr.vmem [resolvable:$true] %s310_s1 }
  0x1d   :  { %361 = vmatpush3.msra.mxu0 %v39_v1  ;;  %366 = vmatpush3.msra.mxu1 %v135_v3  ;;  %v130_v8 = vld [vmem:[#allocation5 + $0x60] sm:$0xff]  ;;  %v129_v9 = vld [vmem:[#allocation5 + $0x58] sm:$0xff]  ;;  %v128_v10 = vld [vmem:[#allocation5 + $0x50] sm:$0xff]  ;;  %s482_s21 = scalar_lea.vmem %s311_s1, 32  ;;  %p487_p11 = scmp.lt.s32.totalorder %s311_s1, %s311_s1 }
  0x1e   :  { %363 = vmatmul.mubr.msk.f32.vlgmr.msra.gmra.mxu0 %vm45_vm1, %v38_v2  ;;  %367 = vmatprep.subr.mxu1 %v512_v0  ;;  %v127_v11 = vld [vmem:[#allocation5 + $0x48] sm:$0xff]  ;;  %v126_v12 = vld [vmem:[#allocation5 + $0x40] sm:$0xff]  ;;  %v125_v13 = vld [vmem:[#allocation5 + $0x38] sm:$0xff]  ;;  %p483_p10 = scmp.ne.s32.totalorder %s311_s1, %s482_s21  ;;  %p488_p12 = scmp.lt.s32.totalorder %s482_s21, %s482_s21 }
  0x1f   :  { %368 = vmatpush3.msra.mxu1 %v134_v4  ;;  %400 = vmatprep.subr.mxu0 %v512_v0  ;;  %v124_v14 = vld [vmem:[#allocation5 + $0x30] sm:$0xff]  ;;  %v123_v15 = vld [vmem:[#allocation5 + $0x28] sm:$0xff]  ;;  %v122_v16 = vld [vmem:[#allocation5 + $0x20] sm:$0xff] }
  0x20   :  { %369 = vmatprep.subr.mxu1 %v512_v0  ;;  %432 = vmatprep.mubr.msk.f32.mxu0 %vm513_vm0, %v512_v0  ;;  %v121_v17 = vld [vmem:[#allocation5 + $0x18] sm:$0xff]  ;;  %v120_v18 = vld [vmem:[#allocation5 + $0x10] sm:$0xff]  ;;  %v226_v20 = vld [vmem:[#allocation5 + $0x108] sm:$0xff]  ;;  %p489_p13 = por %p488_p12, %p487_p11 }
  0x21   :  { %370 = vmatpush3.msra.mxu1 %v133_v5  ;;  %v227_v19 = vld [vmem:[#allocation5 + $0x110] sm:$0xff]  ;;  %v225_v21 = vld [vmem:[#allocation5 + $0x100] sm:$0xff]  ;;  %v224_v22 = vld [vmem:[#allocation5 + $0xf8] sm:$0xff] }
  0x22   :  { %371 = vmatprep.subr.mxu1 %v512_v0  ;;  %401 = vmatpush3.msra.mxu0 %v227_v19  ;;  %v223_v23 = vld [vmem:[#allocation5 + $0xf0] sm:$0xff]  ;;  %v222_v24 = vld [vmem:[#allocation5 + $0xe8] sm:$0xff]  ;;  %v221_v25 = vld [vmem:[#allocation5 + $0xe0] sm:$0xff]  ;;  %p490_p0 = pnand %p489_p13, %p483_p10 }
  0x23   :  { %372 = vmatpush3.msra.mxu1 %v132_v6  ;;  %402 = vmatprep.subr.mxu0 %v512_v0  ;;  %v220_v26 = vld [vmem:[#allocation5 + $0xd8] sm:$0xff]  ;;  %v219_v27 = vld [vmem:[#allocation5 + $0xd0] sm:$0xff]  ;;  %v218_v28 = vld [vmem:[#allocation5 + $0xc8] sm:$0xff] }
  0x24   :  { %373 = vmatprep.subr.mxu1 %v512_v0  ;;  %403 = vmatpush3.msra.mxu0 %v226_v20  ;;  %v217_v29 = vld [vmem:[#allocation5 + $0xc0] sm:$0xff]  ;;  %v216_v30 = vld [vmem:[#allocation5 + $0xb8] sm:$0xff]  ;;  %v215_v31 = vld [vmem:[#allocation5 + $0xb0] sm:$0xff] }
  0x25   :  { %374 = vmatpush3.msra.mxu1 %v131_v7  ;;  %404 = vmatprep.subr.mxu0 %v512_v0  ;;  %v320_v32 = vld [vmem:[#allocation5 + $0x8] ss:$0 sm:$0xff]  ;;  %v213_v38 = vld [vmem:[#allocation5 + $0xa0] sm:$0xff]  ;;  %v212_v39 = vld [vmem:[#allocation5 + $0x98] sm:$0xff] }
  0x26   :  { %375 = vmatprep.subr.mxu1 %v512_v0  ;;  %405 = vmatpush3.msra.mxu0 %v225_v21  ;;  %v214_v37 = vld [vmem:[#allocation5 + $0xa8] sm:$0xff]  ;;  %v322_v40 = vld [vmem:[#allocation5 + $0x90] ss:$0 sm:$0xff]  ;;  %v323_v45 = vld [vmem:[#allocation5 + $0x118] ss:$0 sm:$0xff] }
  0x27   :  { %376 = vmatpush3.msra.mxu1 %v130_v8  ;;  %406 = vmatprep.subr.mxu0 %v512_v0 }
  0x28   :  { %377 = vmatprep.subr.mxu1 %v512_v0  ;;  %407 = vmatpush3.msra.mxu0 %v224_v22 }
  0x29   :  { %378 = vmatpush3.msra.mxu1 %v129_v9  ;;  %408 = vmatprep.subr.mxu0 %v512_v0 }
  0x2a   :  { %379 = vmatprep.subr.mxu1 %v512_v0  ;;  %409 = vmatpush3.msra.mxu0 %v223_v23 }
  0x2b   :  { %380 = vmatpush3.msra.mxu1 %v128_v10  ;;  %410 = vmatprep.subr.mxu0 %v512_v0 }
  0x2c   :  { %381 = vmatprep.subr.mxu1 %v512_v0  ;;  %411 = vmatpush3.msra.mxu0 %v222_v24 }
  0x2d   :  { %382 = vmatpush3.msra.mxu1 %v127_v11  ;;  %412 = vmatprep.subr.mxu0 %v512_v0 }
  0x2e   :  { %383 = vmatprep.subr.mxu1 %v512_v0  ;;  %413 = vmatpush3.msra.mxu0 %v221_v25 }
  0x2f   :  { %384 = vmatpush3.msra.mxu1 %v126_v12  ;;  %414 = vmatprep.subr.mxu0 %v512_v0 }
  0x30   :  { %385 = vmatprep.subr.mxu1 %v512_v0  ;;  %415 = vmatpush3.msra.mxu0 %v220_v26 }
  0x31   :  { %386 = vmatpush3.msra.mxu1 %v125_v13  ;;  %416 = vmatprep.subr.mxu0 %v512_v0 }
  0x32   :  { %387 = vmatprep.subr.mxu1 %v512_v0  ;;  %417 = vmatpush3.msra.mxu0 %v219_v27 }
  0x33   :  { %388 = vmatpush3.msra.mxu1 %v124_v14  ;;  %418 = vmatprep.subr.mxu0 %v512_v0 }
  0x34   :  { %389 = vmatprep.subr.mxu1 %v512_v0  ;;  %419 = vmatpush3.msra.mxu0 %v218_v28 }
  0x35   :  { %390 = vmatpush3.msra.mxu1 %v123_v15  ;;  %420 = vmatprep.subr.mxu0 %v512_v0 }
  0x36   :  { %391 = vmatprep.subr.mxu1 %v512_v0  ;;  %421 = vmatpush3.msra.mxu0 %v217_v29 }
  0x37   :  { %392 = vmatpush3.msra.mxu1 %v122_v16  ;;  %422 = vmatprep.subr.mxu0 %v512_v0 }
  0x38   :  { %393 = vmatprep.subr.mxu1 %v512_v0  ;;  %423 = vmatpush3.msra.mxu0 %v216_v30 }
  0x39   :  { %394 = vmatpush3.msra.mxu1 %v121_v17  ;;  %424 = vmatprep.subr.mxu0 %v512_v0 }
  0x3a   :  { %395 = vmatprep.subr.mxu1 %v512_v0  ;;  %425 = vmatpush3.msra.mxu0 %v215_v31 }
  0x3b   :  { %396 = vmatpush3.msra.mxu1 %v120_v18  ;;  %426 = vmatprep.subr.mxu0 %v512_v0 }
  0x3c   :  { %427 = vmatpush3.msra.mxu0 %v214_v37 }
  0x3d   :  { %428 = vmatprep.subr.mxu0 %v512_v0 }
  0x3e   :  { %429 = vmatpush3.msra.mxu0 %v213_v38 }
  0x3f   :  { %430 = vmatprep.subr.mxu0 %v512_v0 }
  0x40   :  { %431 = vmatpush3.msra.mxu0 %v212_v39 }
  0xde   :  { %v115_v33 = vpop.f32.mrf.mxu0 }
  0xdf   :  { %v116_v34 = vadd.f32 %v320_v32, %v115_v33 }
  0xe0   :  { %v364_v35 = vpop.f32.mrf.mxu0 }
  0xe1   :  { %v119_v36 = vmax.f32 %v116_v34, 0.0 }
  0xe3   :  { %398 = vmatmul.mubr.f32.vlgmr.msra.gmra.mxu1 %v119_v36 }
 0x1a3   :  { %v207_v41 = vpop.f32.mrf.mxu1 }
 0x1a4   :  { %v208_v42 = vadd.f32 %v322_v40, %v207_v41 }
 0x1a5   :  { %v399_v43 = vpop.f32.mrf.mxu1 }
 0x1a6   :  { %v211_v44 = vmax.f32 %v208_v42, 0.0 }
 0x1a8   :  { %433 = vmatmul.mubr.f32.vlgmr.msra.gmra.mxu0 %v211_v44 }
 0x268   :  { %v299_v46 = vpop.f32.mrf.mxu0 }
 0x269   :  { %v300_v47 = vadd.f32 %v323_v45, %v299_v46 }
 0x26a   :  { %v434_v48 = vpop.f32.mrf.mxu0 }
 0x26b   :  { %303 = vst [vmem:[#allocation7] sm:$0x3] %v300_v47 }
 0x26c   :  { %493 = shalt.err (!%p490_p0)
}
 0x26d   :  { %313 = dma.vmem_to_hbm [thread:$0]  %s311_s1, 32, %s580_s2, [#allocation4]  }
 0x26e   :  { %506 = dma.done.wait [#allocation4], 32  }
 0x26f   :  { %507 = vsyncadd [#allocation4], 4294967264 }
 0x270   :  { %317 = vsyncpa [#allocation3], 1 }
 0x271   :  { %318 = vsyncpa [#allocation6], 1 }
 0x272   :  { %319 = vsyncpa [#allocation4], 1 }

</bundles_post_ra>
